<compile_context>
chip_gen: v7x
topology: tpu7x:2x2x1
jax: 0.10.0
libtpu: 0.0.40
codegen_flags: <defaults>
</compile_context>

<pallas_src>
import math

import jax
import jax.numpy as jnp
from jax.experimental import pallas as pl
from jax.experimental.pallas import tpu as pltpu


_VMEM_BLOCK_BUDGET = 24 * 1024 * 1024   # bytes budgeted for pipelined blocks + body temp
_VMEM_LIMIT_BYTES = 32 * 1024 * 1024    # scoped VMEM limit handed to Mosaic (safe on v5e..v7x)


def _scale_offset_kernel(x_ref, scale_ref, offset_ref, o_ref):
    # (row_tile, D) * (1, D) + (1, D): VPU broadcast FMA, compute in f32,
    # store back in the output's native dtype.
    x = x_ref[...].astype(jnp.float32)
    o_ref[...] = (x * scale_ref[...] + offset_ref[...]).astype(o_ref.dtype)


def _round_up(n, m):
    return ((n + m - 1) // m) * m


def _choose_row_tile(rows, d, elt_bytes):
    """Largest sublane-aligned row tile that keeps the kernel inside the VMEM budget."""
    rows_up = _round_up(max(rows, 1), 8)
    # Per row of tile: double-buffered x block + out block (elt_bytes each) and
    # the f32 intermediate produced by the in-kernel upcast.
    per_row_bytes = 4 * d * elt_bytes + 4 * d
    by_budget = max(8, _VMEM_BLOCK_BUDGET // per_row_bytes)
    row_tile = max(8, min(1024, by_budget, rows_up))
    row_tile = (row_tile // 8) * 8
    # Megacore (v7x has 2 TCs): if everything fits in one block but the array is
    # big enough for the split to matter, use >= 2 tiles so both cores get work.
    if row_tile >= rows_up and rows_up > 8 and rows * d * elt_bytes > (1 << 20):
        row_tile = max(8, _round_up((rows_up + 1) // 2, 8))
    return row_tile


def scala_offset(x, scale, offset):
    """x: (..., D). scale/offset: PyTorch layout (1, 1, D). Returns x*scale+offset in x.dtype."""
    orig_shape = x.shape
    d = orig_shape[-1]
    out_dtype = x.dtype

    rows = 1
    for s in orig_shape[:-1]:
        rows *= s

    x2 = x.reshape(rows, d)                                # native dtype, no upcast pass
    scale2 = scale.reshape(1, d).astype(jnp.float32)
    offset2 = offset.reshape(1, d).astype(jnp.float32)

    # Lane-density: if D is not a 128-multiple, fold rows into the lane axis so
    # the output's last dim is a multiple of 128 (unmasked stores). Falls back
    # to the full-D block (still correct) when the row count doesn't divide.
    rows_eff, d_eff = rows, d
    if d % 128 != 0:
        k = math.lcm(d, 128) // d
        if k > 1 and rows % k == 0:
            rows_eff = rows // k
            d_eff = k * d
            x2 = x2.reshape(rows_eff, d_eff)
            scale2 = jnp.tile(scale2, (1, k))
            offset2 = jnp.tile(offset2, (1, k))

    elt_bytes = jnp.dtype(out_dtype).itemsize
    row_tile = _choose_row_tile(rows_eff, d_eff, elt_bytes)
    grid = (pl.cdiv(rows_eff, row_tile),)  # ragged last block: stores are masked by Pallas

    out = pl.pallas_call(
        _scale_offset_kernel,
        out_shape=jax.ShapeDtypeStruct((rows_eff, d_eff), out_dtype),
        grid_spec=pltpu.PrefetchScalarGridSpec(
            num_scalar_prefetch=0,
            grid=grid,
            in_specs=[
                pl.BlockSpec((row_tile, d_eff), lambda i: (i, 0)),   # x tile (pipelined)
                pl.BlockSpec((1, d_eff), lambda i: (0, 0)),          # scale (resident)
                pl.BlockSpec((1, d_eff), lambda i: (0, 0)),          # offset (resident)
            ],
            out_specs=pl.BlockSpec((row_tile, d_eff), lambda i: (i, 0)),
        ),
        compiler_params=pltpu.CompilerParams(
            dimension_semantics=("parallel",),
            vmem_limit_bytes=_VMEM_LIMIT_BYTES,
        ),
    )(x2, scale2, offset2)

    return out.reshape(orig_shape)


def reference(x, scale, offset):
    """Pure-JAX reference matching ScalaOffset.forward (computed in f32, cast to x.dtype)."""
    out = x.astype(jnp.float32) * scale.astype(jnp.float32) + offset.astype(jnp.float32)
    return out.astype(x.dtype)


if __name__ == "__main__":
    # Small shapes consistent with the module: (batch, seq, dim).
    B, T, D = 2, 8, 128
    key = jax.random.PRNGKey(0)
    kx, ks, ko = jax.random.split(key, 3)

    x = jax.random.normal(kx, (B, T, D), jnp.float32)
    # Module initializes scale=1, offset=0 (identity); perturb so the check is non-trivial.
    scale = 1.0 + 0.1 * jax.random.normal(ks, (1, 1, D), jnp.float32)
    offset = 0.1 * jax.random.normal(ko, (1, 1, D), jnp.float32)

    # f32 path
    out = jax.block_until_ready(scala_offset(x, scale, offset))
    ref = reference(x, scale, offset)
    assert out.shape == (B, T, D)
    assert out.dtype == x.dtype
    assert jnp.allclose(out, ref, atol=1e-6, rtol=1e-6)

    # bf16 path: native-dtype I/O with in-kernel f32 compute, output stays bf16.
    xb = x.astype(jnp.bfloat16)
    outb = jax.block_until_ready(scala_offset(xb, scale, offset))
    refb = reference(xb, scale, offset)
    assert outb.dtype == jnp.bfloat16
    assert jnp.allclose(outb.astype(jnp.float32), refb.astype(jnp.float32),
                        atol=2e-2, rtol=2e-2)

    print("KERNEL_OK")
</pallas_src>

<mosaic_0001>
module attributes {stable_mosaic.version = 11 : i64} {
  func.func @_scale_offset_kernel(%arg0: i32, %arg1: memref<16x128xf32, #tpu.memory_space<vmem>>, %arg2: memref<1x128xf32, #tpu.memory_space<vmem>>, %arg3: memref<1x128xf32, #tpu.memory_space<vmem>>, %arg4: memref<16x128xf32, #tpu.memory_space<vmem>>) attributes {dimension_semantics = [#tpu.dimension_semantics<parallel>], iteration_bounds = array<i64: 1>, scalar_prefetch = 0 : i64, scratch_operands = 0 : i64, tpu.core_type = #tpu.core_type<tc>, window_params = [{transform_indices = @transform_0, window_bounds = array<i64: 16, 128>}, {pipeline_mode = #tpu.pipeline_mode<synchronous>, transform_indices = @transform_1, window_bounds = array<i64: 1, 128>}, {pipeline_mode = #tpu.pipeline_mode<synchronous>, transform_indices = @transform_2, window_bounds = array<i64: 1, 128>}, {transform_indices = @transform_3, window_bounds = array<i64: 16, 128>}]} {
    %c0 = arith.constant 0 : index
    %c0_0 = arith.constant 0 : index
    %0 = vector.load %arg1[%c0, %c0_0] : memref<16x128xf32, #tpu.memory_space<vmem>>, vector<16x128xf32>
    %c0_1 = arith.constant 0 : index
    %c0_2 = arith.constant 0 : index
    %1 = vector.load %arg2[%c0_1, %c0_2] : memref<1x128xf32, #tpu.memory_space<vmem>>, vector<1x128xf32>
    %2 = vector.broadcast %1 : vector<1x128xf32> to vector<16x128xf32>
    %3 = arith.mulf %0, %2 : vector<16x128xf32>
    %c0_3 = arith.constant 0 : index
    %c0_4 = arith.constant 0 : index
    %4 = vector.load %arg3[%c0_3, %c0_4] : memref<1x128xf32, #tpu.memory_space<vmem>>, vector<1x128xf32>
    %5 = vector.broadcast %4 : vector<1x128xf32> to vector<16x128xf32>
    %6 = arith.addf %3, %5 : vector<16x128xf32>
    %c0_5 = arith.constant 0 : index
    %c0_6 = arith.constant 0 : index
    %7 = vector.load %arg4[%c0_5, %c0_6] : memref<16x128xf32, #tpu.memory_space<vmem>>, vector<16x128xf32>
    tpu.vector_store %arg4[%c0_5, %c0_6], %6 {strides = array<i32>} : memref<16x128xf32, #tpu.memory_space<vmem>>, vector<16x128xf32>,
    return
  }
  func.func @transform_0(%arg0: i32) -> (i32, i32) {
    %c0_i32 = arith.constant 0 : i32
    %c0_i32_0 = arith.constant 0 : i32
    return %arg0, %c0_i32 : i32, i32
  }
  func.func @transform_1(%arg0: i32) -> (i32, i32) {
    %c0_i32 = arith.constant 0 : i32
    %c0_i32_0 = arith.constant 0 : i32
    %c0_i32_1 = arith.constant 0 : i32
    return %c0_i32, %c0_i32_0 : i32, i32
  }
  func.func @transform_2(%arg0: i32) -> (i32, i32) {
    %c0_i32 = arith.constant 0 : i32
    %c0_i32_0 = arith.constant 0 : i32
    %c0_i32_1 = arith.constant 0 : i32
    return %c0_i32, %c0_i32_0 : i32, i32
  }
  func.func @transform_3(%arg0: i32) -> (i32, i32) {
    %c0_i32 = arith.constant 0 : i32
    %c0_i32_0 = arith.constant 0 : i32
    return %arg0, %c0_i32 : i32, i32
  }
}

</mosaic_0001>

<bundles_post_ra>
// kernel: tpu_custom_call.1
= control target key start
LH: loop header
LB: loop body
LE: loop exit
PB: predicated region body
PF: predicated region fallthrough
CT: control target
= control target key end

     0   :  { %8 = vsyncpa [#allocation3], 0  ;;  %s182_s0 = inlined_call_operand.hbm [shape: f32[16,128], index: 0, kind: input, shape index: {}]   ;;  %s183_s1 = inlined_call_operand.vmem [shape: f32[1,128], index: 1, kind: input, shape index: {}]   ;;  %s184_s2 = inlined_call_operand.vmem [shape: f32[1,128], index: 2, kind: input, shape index: {}]   ;;  %s185_s3 = inlined_call_operand.hbm [shape: f32[16,128], index: 3, kind: output, shape index: {}]  }
   0x1   :  { %9 = vsyncpa [#allocation4], 0  ;;  %s122_s12 = smov [#allocation2]   ;;  %s74_s16 = scalar_lea.hbm %s182_s0, 256 }
   0x2   :  { %s15_s13 = sshll.u32 %s122_s12, 4  ;;  %p75_p0 = scmp.ne.s32.totalorder %s182_s0, %s74_s16  ;;  %s16_s13 = int_to_ptr.vmem [resolvable:$true] %s15_s13 }
   0x3   :  { %p78_p1 = scmp.lt.u32.totalorder %s74_s16, %s182_s0 }
   0x5   :  { %p80_p2 = pnand %p78_p1, %p75_p0 }
   0x7   :  { %83 = shalt.err (!%p80_p2)
}
   0x8   :  { %s84_s21 = scalar_lea.vmem %s16_s13, 256  ;;  %p89_p4 = scmp.lt.s32.totalorder %s16_s13, %s16_s13 }
   0x9   :  { %p85_p3 = scmp.ne.s32.totalorder %s16_s13, %s84_s21  ;;  %p90_p5 = scmp.lt.s32.totalorder %s84_s21, %s84_s21 }
   0xb   :  { %p91_p6 = por %p90_p5, %p89_p4 }
   0xd   :  { %p92_p7 = pnand %p91_p6, %p85_p3 }
   0xf   :  { %95 = shalt.err (!%p92_p7)
}
  0x10   :  { %s123_s22 = smov 128   ;;  %s124_s23 = smov 8  }
  0x11   :  { %21 = dma.hbm_to_vmem [thread:$0]  %s182_s0, 256, %s16_s13, [#allocation3], %s123_s22, %s123_s22, %s124_s23  }
  0x12   :  { %118 = dma.done.wait [#allocation3], 256  }
  0x13   :  { %119 = vsyncadd [#allocation3], 4294967040  ;;  %v29_v0 = vld [vmem:[#allocation2] sm:$0xff]  ;;  %v30_v4 = vld [vmem:[#allocation2 + $0x8] sm:$0xff]  ;;  %s125_s30 = smov [#allocation5]  }
  0x14   :  { %v68_v1 = vld [vmem:[%s183_s1] ss:$0 sm:$0xff]  ;;  %s56_s4 = sshll.u32 %s125_s30, 4  ;;  %s57_s4 = int_to_ptr.vmem [resolvable:$true] %s56_s4 }
  0x15   :  { %v69_v2 = vld [vmem:[%s184_s2] ss:$0 sm:$0xff]  ;;  %v38_v3 = vmul.f32 %v68_v1, %v29_v0  ;;  %v39_v5 = vmul.f32 %v68_v1, %v30_v4  ;;  %s96_s0 = scalar_lea.vmem %s57_s4, 256  ;;  %p101_p9 = scmp.lt.s32.totalorder %s57_s4, %s57_s4 }
  0x16   :  { %p97_p8 = scmp.ne.s32.totalorder %s57_s4, %s96_s0  ;;  %p102_p10 = scmp.lt.s32.totalorder %s96_s0, %s96_s0 }
  0x17   :  { %v47_v6 = vadd.f32 %v69_v2, %v38_v3  ;;  %v48_v7 = vadd.f32 %v69_v2, %v39_v5 }
  0x18   :  { %p103_p11 = por %p102_p10, %p101_p9 }
  0x19   :  { %49 = vst [vmem:[#allocation5] sm:$0xff] %v47_v6  ;;  %50 = vst [vmem:[#allocation5 + $0x8] sm:$0xff] %v48_v7 }
  0x1a   :  { %p104_p12 = pnand %p103_p11, %p97_p8 }
  0x1c   :  { %107 = shalt.err (!%p104_p12)
}
  0x1d   :  { %s108_s2 = scalar_lea.hbm %s185_s3, 256 }
  0x1e   :  { %p109_p13 = scmp.ne.s32.totalorder %s185_s3, %s108_s2  ;;  %p112_p0 = scmp.lt.u32.totalorder %s108_s2, %s185_s3 }
  0x20   :  { %p114_p1 = pnand %p112_p0, %p109_p13 }
  0x22   :  { %117 = shalt.err (!%p114_p1)
}
  0x23   :  { %62 = dma.vmem_to_hbm [thread:$0]  %s57_s4, 256, %s185_s3, [#allocation4], %s123_s22, %s123_s22, %s124_s23  }
  0x24   :  { %120 = dma.done.wait [#allocation4], 256  }
  0x25   :  { %121 = vsyncadd [#allocation4], 4294967040 }
  0x26   :  { %66 = vsyncpa [#allocation3], 1 }
  0x27   :  { %67 = vsyncpa [#allocation4], 1 }

</bundles_post_ra>
